<compile_context>
chip_gen: v5e
topology: v5e:2x2
jax: 0.10.0
libtpu: 0.0.40
codegen_flags: <defaults>
</compile_context>

<pallas_src>
import math
import functools

import jax
import jax.numpy as jnp
from jax import lax
from jax.experimental import pallas as pl
from jax.experimental.pallas import tpu as pltpu


def mhatt_kernel(v_ref, k_ref, q_ref, mask_ref,
                 wv_ref, bv_ref, wk_ref, bk_ref, wq_ref, bq_ref,
                 wm_ref, bm_ref, out_ref, *, num_heads, head_dim, compute_dtype):
    """One grid step handles one batch element."""
    cdt = compute_dtype
    f32 = jnp.float32

    # [S, H] activations for this batch element (already in the MXU operand dtype).
    xv = v_ref[0]
    xk = k_ref[0]
    xq = q_ref[0]

    # Full-width projections: [S, H] @ [H, H] on the MXU, f32 accumulation,
    # f32 bias add.  wq / bq are pre-scaled by 1/sqrt(dh) on the host.
    vh = jnp.dot(xv, wv_ref[...], preferred_element_type=f32) + bv_ref[...]   # [S, H]
    kh = jnp.dot(xk, wk_ref[...], preferred_element_type=f32) + bk_ref[...]   # [S, H]
    qh = jnp.dot(xq, wq_ref[...], preferred_element_type=f32) + bq_ref[...]   # [S, H]

    # Additive key-mask bias (nonzero => masked), computed once per batch element.
    bias = jnp.where(mask_ref[0] > 0.0, -1000000000.0, 0.0)                   # [1, S]

    # Per-head attention: static unroll; slices are static lane sub-ranges.
    ctx_heads = []
    for h in range(num_heads):
        lo = h * head_dim
        hi = lo + head_dim
        q_h = qh[:, lo:hi].astype(cdt)                                        # [S, dh]
        k_h = kh[:, lo:hi].astype(cdt)
        v_h = vh[:, lo:hi].astype(cdt)

        # scores = (q/sqrt(dh)) @ k^T, contracting last dims (no materialized transpose).
        scores = lax.dot_general(
            q_h, k_h, dimension_numbers=(((1,), (1,)), ((), ())),
            preferred_element_type=f32) + bias                                # [S, S]

        # Numerically stable softmax over the key axis, kept in f32 (VPU/EUP).
        m = jnp.max(scores, axis=-1, keepdims=True)
        e = jnp.exp(scores - m)
        p = e * pl.reciprocal(jnp.sum(e, axis=-1, keepdims=True), approx=True)

        # TODO(synk): nn.Dropout on the attention map is identity in eval mode;
        # training-mode dropout (pltpu.prng_seed / prng_random_bits) not implemented.

        ctx_heads.append(jnp.dot(p.astype(cdt), v_h, preferred_element_type=f32))

    # Re-assemble [S, H] head-interleaved context and run ONE full-width merge matmul.
    ctx = jnp.concatenate(ctx_heads, axis=-1).astype(cdt)                     # [S, H]
    out = jnp.dot(ctx, wm_ref[...], preferred_element_type=f32) + bm_ref[...]
    out_ref[0] = out.astype(out_ref.dtype)


def mhatt_forward(v, k, q, mask, params, num_heads, compute_dtype=jnp.bfloat16):
    """v, k, q: [B, S, H]; mask: [B, 1, S] f32 (nonzero => key masked).

    params = (wv, bv, wk, bk, wq, bq, wm, bm); weights pre-transposed [H_in, H_out],
    biases [1, H].  compute_dtype is the MXU operand dtype (accumulation is f32).
    """
    B, S, H = q.shape
    dh = H // num_heads
    wv, bv, wk, bk, wq, bq, wm, bm = params

    # Host-side parameter prep: fold the 1/sqrt(dh) scale into the query projection,
    # cast weights to the MXU operand dtype, keep biases f32 (added to f32 accumulators).
    inv_sqrt_dh = 1.0 / math.sqrt(dh)
    wq_c = (wq * inv_sqrt_dh).astype(compute_dtype)
    bq_c = (bq * inv_sqrt_dh).reshape(1, H).astype(jnp.float32)
    wv_c = wv.astype(compute_dtype)
    wk_c = wk.astype(compute_dtype)
    wm_c = wm.astype(compute_dtype)
    bv_c = bv.reshape(1, H).astype(jnp.float32)
    bk_c = bk.reshape(1, H).astype(jnp.float32)
    bm_c = bm.reshape(1, H).astype(jnp.float32)

    # Host-side activation cast (once), halves activation HBM traffic in bf16 mode.
    v_c = v.astype(compute_dtype)
    k_c = k.astype(compute_dtype)
    q_c = q.astype(compute_dtype)
    mask_f = mask.astype(jnp.float32)

    # BlockSpecs: activations / mask / output tiled per batch; weights & biases have
    # constant index_maps -> DMA'd once and VMEM-resident for the whole kernel.
    x_spec = pl.BlockSpec((1, S, H), lambda b: (b, 0, 0))
    mask_spec = pl.BlockSpec((1, 1, S), lambda b: (b, 0, 0))
    w_spec = pl.BlockSpec((H, H), lambda b: (0, 0))
    b_spec = pl.BlockSpec((1, H), lambda b: (0, 0))
    out_spec = pl.BlockSpec((1, S, H), lambda b: (b, 0, 0))

    act_item = jnp.dtype(compute_dtype).itemsize

    # Advisory cost estimate (weights counted once; output write included).
    cost = pl.CostEstimate(
        flops=int(B * (8 * S * H * H + 4 * S * S * H)),
        transcendentals=int(B * num_heads * S * S),
        bytes_accessed=int(3 * B * S * H * act_item      # v, k, q reads
                           + B * S * 4                   # mask
                           + 4 * H * H * act_item        # weights (resident, once)
                           + 4 * H * 4                   # biases
                           + B * S * H * 4))             # output write

    # Scoped-VMEM sizing: double-buffered activation/output blocks + resident weights
    # + in-kernel f32 intermediates, clamped to [32 MiB default, 64 MiB v7x physical].
    per_batch_live = (3 * S * H * act_item + S * H * 4
                      + 10 * S * H * 4 + 3 * S * S * 4)
    resident = 4 * H * H * act_item + 4 * H * 4
    vmem_limit = int(min(max(2 * per_batch_live + resident, 32 * 1024 * 1024),
                         64 * 1024 * 1024))

    kernel = functools.partial(mhatt_kernel, num_heads=num_heads, head_dim=dh,
                               compute_dtype=compute_dtype)

    return pl.pallas_call(
        kernel,
        out_shape=jax.ShapeDtypeStruct((B, S, H), jnp.float32),
        grid=(B,),
        in_specs=[x_spec, x_spec, x_spec, mask_spec,
                  w_spec, b_spec, w_spec, b_spec, w_spec, b_spec,
                  w_spec, b_spec],
        out_specs=out_spec,
        compiler_params=pltpu.CompilerParams(
            dimension_semantics=("parallel",),
            vmem_limit_bytes=vmem_limit),
        cost_estimate=cost,
    )(v_c, k_c, q_c, mask_f,
      wv_c, bv_c, wk_c, bk_c, wq_c, bq_c, wm_c, bm_c)


def mhatt_reference(v, k, q, mask, params, num_heads):
    """Pure-JAX reference mirroring the PyTorch forward (eval mode, f32)."""
    wv, bv, wk, bk, wq, bq, wm, bm = params
    B, S, H = q.shape
    dh = H // num_heads

    def split_heads(x):  # [B,S,H] -> [B,nh,S,dh]
        return x.reshape(B, S, num_heads, dh).transpose(0, 2, 1, 3)

    vp = split_heads(v @ wv + bv)
    kp = split_heads(k @ wk + bk)
    qp = split_heads(q @ wq + bq)

    scores = jnp.einsum("bhqd,bhkd->bhqk", qp, kp) / math.sqrt(dh)
    scores = jnp.where(mask[:, None, :, :] > 0.0, -1000000000.0, scores)
    att = jax.nn.softmax(scores, axis=-1)
    out = jnp.einsum("bhqk,bhkd->bhqd", att, vp)
    out = out.transpose(0, 2, 1, 3).reshape(B, S, H)
    return out @ wm + bm


def init_linear(key, h):
    """Deterministic nn.Linear-style init, weight returned pre-transposed [in, out]."""
    kw, kb = jax.random.split(key)
    bound = 1.0 / math.sqrt(h)
    w = jax.random.uniform(kw, (h, h), jnp.float32, -bound, bound)
    b = jax.random.uniform(kb, (1, h), jnp.float32, -bound, bound)
    return w, b


if __name__ == "__main__":
    # Small but lane-dense demo shapes (H multiple of 128 -> unmasked output stores).
    B, S, H, NUM_HEADS = 2, 16, 128, 4

    key = jax.random.PRNGKey(0)
    keys = jax.random.split(key, 8)

    wv, bv = init_linear(keys[0], H)
    wk, bk = init_linear(keys[1], H)
    wq, bq = init_linear(keys[2], H)
    wm, bm = init_linear(keys[3], H)
    params = (wv, bv, wk, bk, wq, bq, wm, bm)

    v = jax.random.normal(keys[4], (B, S, H), jnp.float32)
    k = jax.random.normal(keys[5], (B, S, H), jnp.float32)
    q = jax.random.normal(keys[6], (B, S, H), jnp.float32)

    # Mask out the last three key positions of batch 1, nothing in batch 0.
    mask = jnp.zeros((B, 1, S), jnp.float32)
    mask = mask.at[1, 0, S - 3:].set(1.0)

    ref = mhatt_reference(v, k, q, mask, params, NUM_HEADS)

    # f32 MXU operands: tight structural/math check.
    out_f32 = jax.block_until_ready(
        mhatt_forward(v, k, q, mask, params, NUM_HEADS, compute_dtype=jnp.float32))
    assert out_f32.shape == (B, S, H)
    assert jnp.allclose(out_f32, ref, atol=1e-2, rtol=1e-2), "f32 kernel mismatch vs reference"

    # bf16 MXU operands + f32 accumulation: production configuration.
    out_bf16 = jax.block_until_ready(
        mhatt_forward(v, k, q, mask, params, NUM_HEADS, compute_dtype=jnp.bfloat16))
    assert out_bf16.shape == (B, S, H)
    assert jnp.allclose(out_bf16, ref, atol=5e-2, rtol=5e-2), "bf16 kernel mismatch vs reference"

    print("KERNEL_OK")
</pallas_src>

<mosaic_0001>
module attributes {stable_mosaic.version = 11 : i64} {
  func.func @mhatt_kernel(%arg0: i32, %arg1: memref<1x16x128xf32, #tpu.memory_space<vmem>>, %arg2: memref<1x16x128xf32, #tpu.memory_space<vmem>>, %arg3: memref<1x16x128xf32, #tpu.memory_space<vmem>>, %arg4: memref<1x1x16xf32, #tpu.memory_space<vmem>>, %arg5: memref<128x128xf32, #tpu.memory_space<vmem>>, %arg6: memref<1x128xf32, #tpu.memory_space<vmem>>, %arg7: memref<128x128xf32, #tpu.memory_space<vmem>>, %arg8: memref<1x128xf32, #tpu.memory_space<vmem>>, %arg9: memref<128x128xf32, #tpu.memory_space<vmem>>, %arg10: memref<1x128xf32, #tpu.memory_space<vmem>>, %arg11: memref<128x128xf32, #tpu.memory_space<vmem>>, %arg12: memref<1x128xf32, #tpu.memory_space<vmem>>, %arg13: memref<1x16x128xf32, #tpu.memory_space<vmem>>) attributes {dimension_semantics = [#tpu.dimension_semantics<parallel>], iteration_bounds = array<i64: 2>, scalar_prefetch = 0 : i64, scratch_operands = 0 : i64, tpu.core_type = #tpu.core_type<tc>, window_params = [{transform_indices = @transform_0, window_bounds = array<i64: 1, 16, 128>}, {transform_indices = @transform_1, window_bounds = array<i64: 1, 16, 128>}, {transform_indices = @transform_2, window_bounds = array<i64: 1, 16, 128>}, {transform_indices = @transform_3, window_bounds = array<i64: 1, 1, 16>}, {pipeline_mode = #tpu.pipeline_mode<synchronous>, transform_indices = @transform_4, window_bounds = array<i64: 128, 128>}, {pipeline_mode = #tpu.pipeline_mode<synchronous>, transform_indices = @transform_5, window_bounds = array<i64: 1, 128>}, {pipeline_mode = #tpu.pipeline_mode<synchronous>, transform_indices = @transform_6, window_bounds = array<i64: 128, 128>}, {pipeline_mode = #tpu.pipeline_mode<synchronous>, transform_indices = @transform_7, window_bounds = array<i64: 1, 128>}, {pipeline_mode = #tpu.pipeline_mode<synchronous>, transform_indices = @transform_8, window_bounds = array<i64: 128, 128>}, {pipeline_mode = #tpu.pipeline_mode<synchronous>, transform_indices = @transform_9, window_bounds = array<i64: 1, 128>}, {pipeline_mode = #tpu.pipeline_mode<synchronous>, transform_indices = @transform_10, window_bounds = array<i64: 128, 128>}, {pipeline_mode = #tpu.pipeline_mode<synchronous>, transform_indices = @transform_11, window_bounds = array<i64: 1, 128>}, {transform_indices = @transform_12, window_bounds = array<i64: 1, 16, 128>}]} {
    %c0 = arith.constant 0 : index
    %c0_0 = arith.constant 0 : index
    %c0_1 = arith.constant 0 : index
    %0 = vector.load %arg1[%c0, %c0_0, %c0_1] : memref<1x16x128xf32, #tpu.memory_space<vmem>>, vector<1x16x128xf32>
    %1 = vector.shape_cast %0 : vector<1x16x128xf32> to vector<16x128xf32>
    %c0_2 = arith.constant 0 : index
    %c0_3 = arith.constant 0 : index
    %c0_4 = arith.constant 0 : index
    %2 = vector.load %arg2[%c0_2, %c0_3, %c0_4] : memref<1x16x128xf32, #tpu.memory_space<vmem>>, vector<1x16x128xf32>
    %3 = vector.shape_cast %2 : vector<1x16x128xf32> to vector<16x128xf32>
    %c0_5 = arith.constant 0 : index
    %c0_6 = arith.constant 0 : index
    %c0_7 = arith.constant 0 : index
    %4 = vector.load %arg3[%c0_5, %c0_6, %c0_7] : memref<1x16x128xf32, #tpu.memory_space<vmem>>, vector<1x16x128xf32>
    %5 = vector.shape_cast %4 : vector<1x16x128xf32> to vector<16x128xf32>
    %c0_8 = arith.constant 0 : index
    %c0_9 = arith.constant 0 : index
    %6 = vector.load %arg5[%c0_8, %c0_9] : memref<128x128xf32, #tpu.memory_space<vmem>>, vector<128x128xf32>
    %cst = arith.constant dense<0.000000e+00> : vector<16x128xf32>
    %7 = tpu.matmul %1, %6, %cst {dimension_numbers = #tpu.dot_dimension_numbers<[1], [0], [0], [1], [0, 0, 1, 1], [], []>} : vector<16x128xf32>, vector<128x128xf32>, vector<16x128xf32> -> vector<16x128xf32>
    %c0_10 = arith.constant 0 : index
    %c0_11 = arith.constant 0 : index
    %8 = vector.load %arg6[%c0_10, %c0_11] : memref<1x128xf32, #tpu.memory_space<vmem>>, vector<1x128xf32>
    %9 = vector.broadcast %8 : vector<1x128xf32> to vector<16x128xf32>
    %10 = arith.addf %7, %9 : vector<16x128xf32>
    %c0_12 = arith.constant 0 : index
    %c0_13 = arith.constant 0 : index
    %11 = vector.load %arg7[%c0_12, %c0_13] : memref<128x128xf32, #tpu.memory_space<vmem>>, vector<128x128xf32>
    %cst_14 = arith.constant dense<0.000000e+00> : vector<16x128xf32>
    %12 = tpu.matmul %3, %11, %cst_14 {dimension_numbers = #tpu.dot_dimension_numbers<[1], [0], [0], [1], [0, 0, 1, 1], [], []>} : vector<16x128xf32>, vector<128x128xf32>, vector<16x128xf32> -> vector<16x128xf32>
    %c0_15 = arith.constant 0 : index
    %c0_16 = arith.constant 0 : index
    %13 = vector.load %arg8[%c0_15, %c0_16] : memref<1x128xf32, #tpu.memory_space<vmem>>, vector<1x128xf32>
    %14 = vector.broadcast %13 : vector<1x128xf32> to vector<16x128xf32>
    %15 = arith.addf %12, %14 : vector<16x128xf32>
    %c0_17 = arith.constant 0 : index
    %c0_18 = arith.constant 0 : index
    %16 = vector.load %arg9[%c0_17, %c0_18] : memref<128x128xf32, #tpu.memory_space<vmem>>, vector<128x128xf32>
    %cst_19 = arith.constant dense<0.000000e+00> : vector<16x128xf32>
    %17 = tpu.matmul %5, %16, %cst_19 {dimension_numbers = #tpu.dot_dimension_numbers<[1], [0], [0], [1], [0, 0, 1, 1], [], []>} : vector<16x128xf32>, vector<128x128xf32>, vector<16x128xf32> -> vector<16x128xf32>
    %c0_20 = arith.constant 0 : index
    %c0_21 = arith.constant 0 : index
    %18 = vector.load %arg10[%c0_20, %c0_21] : memref<1x128xf32, #tpu.memory_space<vmem>>, vector<1x128xf32>
    %19 = vector.broadcast %18 : vector<1x128xf32> to vector<16x128xf32>
    %20 = arith.addf %17, %19 : vector<16x128xf32>
    %c0_22 = arith.constant 0 : index
    %c0_23 = arith.constant 0 : index
    %c0_24 = arith.constant 0 : index
    %21 = vector.load %arg4[%c0_22, %c0_23, %c0_24] : memref<1x1x16xf32, #tpu.memory_space<vmem>>, vector<1x1x16xf32>
    %22 = vector.shape_cast %21 : vector<1x1x16xf32> to vector<1x16xf32>
    %cst_25 = arith.constant 0.000000e+00 : f32
    %23 = vector.broadcast %cst_25 : f32 to vector<1x16xf32>
    %24 = arith.cmpf ogt, %22, %23 : vector<1x16xf32>
    %cst_26 = arith.constant -1.000000e+09 : f32
    %cst_27 = arith.constant 0.000000e+00 : f32
    %25 = vector.broadcast %cst_26 : f32 to vector<1x16xf32>
    %26 = vector.broadcast %cst_27 : f32 to vector<1x16xf32>
    %27 = arith.select %24, %25, %26 : vector<1x16xi1>, vector<1x16xf32>
    %28 = vector.extract_strided_slice %20 {offsets = [0, 0], sizes = [16, 32], strides = [1, 1]} : vector<16x128xf32> to vector<16x32xf32>
    %29 = vector.extract_strided_slice %15 {offsets = [0, 0], sizes = [16, 32], strides = [1, 1]} : vector<16x128xf32> to vector<16x32xf32>
    %30 = vector.extract_strided_slice %10 {offsets = [0, 0], sizes = [16, 32], strides = [1, 1]} : vector<16x128xf32> to vector<16x32xf32>
    %cst_28 = arith.constant dense<0.000000e+00> : vector<16x16xf32>
    %31 = tpu.matmul %28, %29, %cst_28 {dimension_numbers = #tpu.dot_dimension_numbers<[1], [1], [0], [0], [0, 0, 1, 0], [], []>} : vector<16x32xf32>, vector<16x32xf32>, vector<16x16xf32> -> vector<16x16xf32>
    %32 = vector.broadcast %27 : vector<1x16xf32> to vector<16x16xf32>
    %33 = arith.addf %31, %32 : vector<16x16xf32>
    %cst_29 = arith.constant dense<0xFF800000> : vector<16xf32>
    %34 = vector.multi_reduction <maximumf>, %33, %cst_29 [1] : vector<16x16xf32> to vector<16xf32>
    %35 = vector.shape_cast %34 : vector<16xf32> to vector<16x1xf32>
    %36 = vector.broadcast %35 : vector<16x1xf32> to vector<16x16xf32>
    %37 = arith.subf %33, %36 : vector<16x16xf32>
    %38 = math.exp %37 : vector<16x16xf32>
    %cst_30 = arith.constant dense<0.000000e+00> : vector<16xf32>
    %39 = vector.multi_reduction <add>, %38, %cst_30 [1] : vector<16x16xf32> to vector<16xf32>
    %40 = vector.shape_cast %39 : vector<16xf32> to vector<16x1xf32>
    %41 = tpu.reciprocal %40 {approx = true} : vector<16x1xf32> -> vector<16x1xf32>
    %42 = vector.broadcast %41 : vector<16x1xf32> to vector<16x16xf32>
    %43 = arith.mulf %38, %42 : vector<16x16xf32>
    %cst_31 = arith.constant dense<0.000000e+00> : vector<16x32xf32>
    %44 = tpu.matmul %43, %30, %cst_31 {dimension_numbers = #tpu.dot_dimension_numbers<[1], [0], [0], [1], [0, 0, 1, 1], [], []>} : vector<16x16xf32>, vector<16x32xf32>, vector<16x32xf32> -> vector<16x32xf32>
    %45 = vector.extract_strided_slice %20 {offsets = [0, 32], sizes = [16, 32], strides = [1, 1]} : vector<16x128xf32> to vector<16x32xf32>
    %46 = vector.extract_strided_slice %15 {offsets = [0, 32], sizes = [16, 32], strides = [1, 1]} : vector<16x128xf32> to vector<16x32xf32>
    %47 = vector.extract_strided_slice %10 {offsets = [0, 32], sizes = [16, 32], strides = [1, 1]} : vector<16x128xf32> to vector<16x32xf32>
    %cst_32 = arith.constant dense<0.000000e+00> : vector<16x16xf32>
    %48 = tpu.matmul %45, %46, %cst_32 {dimension_numbers = #tpu.dot_dimension_numbers<[1], [1], [0], [0], [0, 0, 1, 0], [], []>} : vector<16x32xf32>, vector<16x32xf32>, vector<16x16xf32> -> vector<16x16xf32>
    %49 = vector.broadcast %27 : vector<1x16xf32> to vector<16x16xf32>
    %50 = arith.addf %48, %49 : vector<16x16xf32>
    %cst_33 = arith.constant dense<0xFF800000> : vector<16xf32>
    %51 = vector.multi_reduction <maximumf>, %50, %cst_33 [1] : vector<16x16xf32> to vector<16xf32>
    %52 = vector.shape_cast %51 : vector<16xf32> to vector<16x1xf32>
    %53 = vector.broadcast %52 : vector<16x1xf32> to vector<16x16xf32>
    %54 = arith.subf %50, %53 : vector<16x16xf32>
    %55 = math.exp %54 : vector<16x16xf32>
    %cst_34 = arith.constant dense<0.000000e+00> : vector<16xf32>
    %56 = vector.multi_reduction <add>, %55, %cst_34 [1] : vector<16x16xf32> to vector<16xf32>
    %57 = vector.shape_cast %56 : vector<16xf32> to vector<16x1xf32>
    %58 = tpu.reciprocal %57 {approx = true} : vector<16x1xf32> -> vector<16x1xf32>
    %59 = vector.broadcast %58 : vector<16x1xf32> to vector<16x16xf32>
    %60 = arith.mulf %55, %59 : vector<16x16xf32>
    %cst_35 = arith.constant dense<0.000000e+00> : vector<16x32xf32>
    %61 = tpu.matmul %60, %47, %cst_35 {dimension_numbers = #tpu.dot_dimension_numbers<[1], [0], [0], [1], [0, 0, 1, 1], [], []>} : vector<16x16xf32>, vector<16x32xf32>, vector<16x32xf32> -> vector<16x32xf32>
    %62 = vector.extract_strided_slice %20 {offsets = [0, 64], sizes = [16, 32], strides = [1, 1]} : vector<16x128xf32> to vector<16x32xf32>
    %63 = vector.extract_strided_slice %15 {offsets = [0, 64], sizes = [16, 32], strides = [1, 1]} : vector<16x128xf32> to vector<16x32xf32>
    %64 = vector.extract_strided_slice %10 {offsets = [0, 64], sizes = [16, 32], strides = [1, 1]} : vector<16x128xf32> to vector<16x32xf32>
    %cst_36 = arith.constant dense<0.000000e+00> : vector<16x16xf32>
    %65 = tpu.matmul %62, %63, %cst_36 {dimension_numbers = #tpu.dot_dimension_numbers<[1], [1], [0], [0], [0, 0, 1, 0], [], []>} : vector<16x32xf32>, vector<16x32xf32>, vector<16x16xf32> -> vector<16x16xf32>
    %66 = vector.broadcast %27 : vector<1x16xf32> to vector<16x16xf32>
    %67 = arith.addf %65, %66 : vector<16x16xf32>
    %cst_37 = arith.constant dense<0xFF800000> : vector<16xf32>
    %68 = vector.multi_reduction <maximumf>, %67, %cst_37 [1] : vector<16x16xf32> to vector<16xf32>
    %69 = vector.shape_cast %68 : vector<16xf32> to vector<16x1xf32>
    %70 = vector.broadcast %69 : vector<16x1xf32> to vector<16x16xf32>
    %71 = arith.subf %67, %70 : vector<16x16xf32>
    %72 = math.exp %71 : vector<16x16xf32>
    %cst_38 = arith.constant dense<0.000000e+00> : vector<16xf32>
    %73 = vector.multi_reduction <add>, %72, %cst_38 [1] : vector<16x16xf32> to vector<16xf32>
    %74 = vector.shape_cast %73 : vector<16xf32> to vector<16x1xf32>
    %75 = tpu.reciprocal %74 {approx = true} : vector<16x1xf32> -> vector<16x1xf32>
    %76 = vector.broadcast %75 : vector<16x1xf32> to vector<16x16xf32>
    %77 = arith.mulf %72, %76 : vector<16x16xf32>
    %cst_39 = arith.constant dense<0.000000e+00> : vector<16x32xf32>
    %78 = tpu.matmul %77, %64, %cst_39 {dimension_numbers = #tpu.dot_dimension_numbers<[1], [0], [0], [1], [0, 0, 1, 1], [], []>} : vector<16x16xf32>, vector<16x32xf32>, vector<16x32xf32> -> vector<16x32xf32>
    %79 = vector.extract_strided_slice %20 {offsets = [0, 96], sizes = [16, 32], strides = [1, 1]} : vector<16x128xf32> to vector<16x32xf32>
    %80 = vector.extract_strided_slice %15 {offsets = [0, 96], sizes = [16, 32], strides = [1, 1]} : vector<16x128xf32> to vector<16x32xf32>
    %81 = vector.extract_strided_slice %10 {offsets = [0, 96], sizes = [16, 32], strides = [1, 1]} : vector<16x128xf32> to vector<16x32xf32>
    %cst_40 = arith.constant dense<0.000000e+00> : vector<16x16xf32>
    %82 = tpu.matmul %79, %80, %cst_40 {dimension_numbers = #tpu.dot_dimension_numbers<[1], [1], [0], [0], [0, 0, 1, 0], [], []>} : vector<16x32xf32>, vector<16x32xf32>, vector<16x16xf32> -> vector<16x16xf32>
    %83 = vector.broadcast %27 : vector<1x16xf32> to vector<16x16xf32>
    %84 = arith.addf %82, %83 : vector<16x16xf32>
    %cst_41 = arith.constant dense<0xFF800000> : vector<16xf32>
    %85 = vector.multi_reduction <maximumf>, %84, %cst_41 [1] : vector<16x16xf32> to vector<16xf32>
    %86 = vector.shape_cast %85 : vector<16xf32> to vector<16x1xf32>
    %87 = vector.broadcast %86 : vector<16x1xf32> to vector<16x16xf32>
    %88 = arith.subf %84, %87 : vector<16x16xf32>
    %89 = math.exp %88 : vector<16x16xf32>
    %cst_42 = arith.constant dense<0.000000e+00> : vector<16xf32>
    %90 = vector.multi_reduction <add>, %89, %cst_42 [1] : vector<16x16xf32> to vector<16xf32>
    %91 = vector.shape_cast %90 : vector<16xf32> to vector<16x1xf32>
    %92 = tpu.reciprocal %91 {approx = true} : vector<16x1xf32> -> vector<16x1xf32>
    %93 = vector.broadcast %92 : vector<16x1xf32> to vector<16x16xf32>
    %94 = arith.mulf %89, %93 : vector<16x16xf32>
    %cst_43 = arith.constant dense<0.000000e+00> : vector<16x32xf32>
    %95 = tpu.matmul %94, %81, %cst_43 {dimension_numbers = #tpu.dot_dimension_numbers<[1], [0], [0], [1], [0, 0, 1, 1], [], []>} : vector<16x16xf32>, vector<16x32xf32>, vector<16x32xf32> -> vector<16x32xf32>
    %96 = tpu.concatenate %44, %61, %78, %95 in 1 : vector<16x32xf32>, vector<16x32xf32>, vector<16x32xf32>, vector<16x32xf32> -> vector<16x128xf32>
    %c0_44 = arith.constant 0 : index
    %c0_45 = arith.constant 0 : index
    %97 = vector.load %arg11[%c0_44, %c0_45] : memref<128x128xf32, #tpu.memory_space<vmem>>, vector<128x128xf32>
    %cst_46 = arith.constant dense<0.000000e+00> : vector<16x128xf32>
    %98 = tpu.matmul %96, %97, %cst_46 {dimension_numbers = #tpu.dot_dimension_numbers<[1], [0], [0], [1], [0, 0, 1, 1], [], []>} : vector<16x128xf32>, vector<128x128xf32>, vector<16x128xf32> -> vector<16x128xf32>
    %c0_47 = arith.constant 0 : index
    %c0_48 = arith.constant 0 : index
    %99 = vector.load %arg12[%c0_47, %c0_48] : memref<1x128xf32, #tpu.memory_space<vmem>>, vector<1x128xf32>
    %100 = vector.broadcast %99 : vector<1x128xf32> to vector<16x128xf32>
    %101 = arith.addf %98, %100 : vector<16x128xf32>
    %c0_49 = arith.constant 0 : index
    %c0_50 = arith.constant 0 : index
    %c0_51 = arith.constant 0 : index
    %102 = vector.load %arg13[%c0_49, %c0_50, %c0_51] : memref<1x16x128xf32, #tpu.memory_space<vmem>>, vector<1x16x128xf32>
    %103 = vector.shape_cast %102 : vector<1x16x128xf32> to vector<16x128xf32>
    %104 = vector.shape_cast %101 : vector<16x128xf32> to vector<1x16x128xf32>
    tpu.vector_store %arg13[%c0_49, %c0_50, %c0_51], %104 {strides = array<i32>} : memref<1x16x128xf32, #tpu.memory_space<vmem>>, vector<1x16x128xf32>,
    return
  }
  func.func @transform_0(%arg0: i32) -> (i32, i32, i32) {
    %c0_i32 = arith.constant 0 : i32
    %c0_i32_0 = arith.constant 0 : i32
    %c0_i32_1 = arith.constant 0 : i32
    return %arg0, %c0_i32, %c0_i32_0 : i32, i32, i32
  }
  func.func @transform_1(%arg0: i32) -> (i32, i32, i32) {
    %c0_i32 = arith.constant 0 : i32
    %c0_i32_0 = arith.constant 0 : i32
    %c0_i32_1 = arith.constant 0 : i32
    return %arg0, %c0_i32, %c0_i32_0 : i32, i32, i32
  }
  func.func @transform_2(%arg0: i32) -> (i32, i32, i32) {
    %c0_i32 = arith.constant 0 : i32
    %c0_i32_0 = arith.constant 0 : i32
    %c0_i32_1 = arith.constant 0 : i32
    return %arg0, %c0_i32, %c0_i32_0 : i32, i32, i32
  }
  func.func @transform_3(%arg0: i32) -> (i32, i32, i32) {
    %c0_i32 = arith.constant 0 : i32
    %c0_i32_0 = arith.constant 0 : i32
    %c0_i32_1 = arith.constant 0 : i32
    return %arg0, %c0_i32, %c0_i32_0 : i32, i32, i32
  }
  func.func @transform_4(%arg0: i32) -> (i32, i32) {
    %c0_i32 = arith.constant 0 : i32
    %c0_i32_0 = arith.constant 0 : i32
    %c0_i32_1 = arith.constant 0 : i32
    return %c0_i32, %c0_i32_0 : i32, i32
  }
  func.func @transform_5(%arg0: i32) -> (i32, i32) {
    %c0_i32 = arith.constant 0 : i32
    %c0_i32_0 = arith.constant 0 : i32
    %c0_i32_1 = arith.constant 0 : i32
    return %c0_i32, %c0_i32_0 : i32, i32
  }
  func.func @transform_6(%arg0: i32) -> (i32, i32) {
    %c0_i32 = arith.constant 0 : i32
    %c0_i32_0 = arith.constant 0 : i32
    %c0_i32_1 = arith.constant 0 : i32
    return %c0_i32, %c0_i32_0 : i32, i32
  }
  func.func @transform_7(%arg0: i32) -> (i32, i32) {
    %c0_i32 = arith.constant 0 : i32
    %c0_i32_0 = arith.constant 0 : i32
    %c0_i32_1 = arith.constant 0 : i32
    return %c0_i32, %c0_i32_0 : i32, i32
  }
  func.func @transform_8(%arg0: i32) -> (i32, i32) {
    %c0_i32 = arith.constant 0 : i32
    %c0_i32_0 = arith.constant 0 : i32
    %c0_i32_1 = arith.constant 0 : i32
    return %c0_i32, %c0_i32_0 : i32, i32
  }
  func.func @transform_9(%arg0: i32) -> (i32, i32) {
    %c0_i32 = arith.constant 0 : i32
    %c0_i32_0 = arith.constant 0 : i32
    %c0_i32_1 = arith.constant 0 : i32
    return %c0_i32, %c0_i32_0 : i32, i32
  }
  func.func @transform_10(%arg0: i32) -> (i32, i32) {
    %c0_i32 = arith.constant 0 : i32
    %c0_i32_0 = arith.constant 0 : i32
    %c0_i32_1 = arith.constant 0 : i32
    return %c0_i32, %c0_i32_0 : i32, i32
  }
  func.func @transform_11(%arg0: i32) -> (i32, i32) {
    %c0_i32 = arith.constant 0 : i32
    %c0_i32_0 = arith.constant 0 : i32
    %c0_i32_1 = arith.constant 0 : i32
    return %c0_i32, %c0_i32_0 : i32, i32
  }
  func.func @transform_12(%arg0: i32) -> (i32, i32, i32) {
    %c0_i32 = arith.constant 0 : i32
    %c0_i32_0 = arith.constant 0 : i32
    %c0_i32_1 = arith.constant 0 : i32
    return %arg0, %c0_i32, %c0_i32_0 : i32, i32, i32
  }
}

</mosaic_0001>

<bundles_post_ra>
// kernel: tpu_custom_call.1
= control target key start
LH: loop header
LB: loop body
LE: loop exit
PB: predicated region body
PF: predicated region fallthrough
CT: control target
= control target key end

     0   :  { %s2322_s0 = inlined_call_operand.hbm [shape: f32[2,16,128], index: 0, kind: input, shape index: {}]   ;;  %s2323_s1 = inlined_call_operand.hbm [shape: f32[2,16,128], index: 1, kind: input, shape index: {}]   ;;  %s2324_s2 = inlined_call_operand.hbm [shape: f32[2,16,128], index: 2, kind: input, shape index: {}]   ;;  %s2325_s3 = inlined_call_operand.vmem [shape: f32[2,1,16], index: 3, kind: input, shape index: {}]   ;;  %s2326_s4 = inlined_call_operand.hbm [shape: f32[128,128], index: 4, kind: input, shape index: {}]   ;;  %s2327_s5 = inlined_call_operand.vmem [shape: f32[1,128], index: 5, kind: input, shape index: {}]   ;;  %s2328_s6 = inlined_call_operand.hbm [shape: f32[128,128], index: 6, kind: input, shape index: {}]   ;;  %s2329_s7 = inlined_call_operand.vmem [shape: f32[1,128], index: 7, kind: input, shape index: {}]   ;;  %s2330_s8 = inlined_call_operand.hbm [shape: f32[128,128], index: 8, kind: input, shape index: {}]   ;;  %s2331_s9 = inlined_call_operand.vmem [shape: f32[1,128], index: 9, kind: input, shape index: {}]   ;;  %s2332_s10 = inlined_call_operand.hbm [shape: f32[128,128], index: 10, kind: input, shape index: {}]   ;;  %s2333_s11 = inlined_call_operand.vmem [shape: f32[1,128], index: 11, kind: input, shape index: {}]   ;;  %s2334_s12 = inlined_call_operand.hbm [shape: f32[2,16,128], index: 12, kind: output, shape index: {}]  }
   0x1   :  { %2349 = sst [smem:[#allocation26_spill]] %s2323_s1 }
   0x2   :  { %2350 = sst [smem:[#allocation27_spill]] %s2326_s4 }
   0x3   :  { %2351 = sst [smem:[#allocation28_spill]] %s2328_s6 }
   0x4   :  { %2352 = sst [smem:[#allocation29_spill]] %s2330_s8 }
   0x5   :  { %2353 = sst [smem:[#allocation30_spill]] %s2332_s10 }
   0x6   :  { %2354 = sst [smem:[#allocation31_spill]] %s2334_s12 }
   0x7   :  { %17 = vsyncpa [#allocation3], 0 }
   0x8   :  { %19 = vsyncpa [#allocation3 + $0x1], 0 }
   0x9   :  { %20 = vsyncpa [#allocation6], 0 }
   0xa   :  { %22 = vsyncpa [#allocation6 + $0x1], 0 }
   0xb   :  { %23 = vsyncpa [#allocation9], 0 }
   0xc   :  { %24 = vsyncpa [#allocation12], 0 }
   0xd   :  { %25 = vsyncpa [#allocation4], 0 }
   0xe   :  { %27 = vsyncpa [#allocation4 + $0x1], 0  ;;  %s1951_s21 = smov 0   ;;  %s1953_s22 = smov 0  }
   0xf   :  { %s1955_s23 = smov 0   ;;  %s1957_s24 = smov 0  }
  0x10 LB: > { %2355 = sst [smem:[#allocation20_spill]] %s1860_s21  ;;  %s1972_s25 = sadd.s32 4294967295, %s1872_s24   ;;  %s1872_s24 = sphi %s1957_s24, %s2385_s24   ;;  %s1868_s23 = sphi %s1955_s23, %s2389_s23   ;;  %s1864_s22 = sphi %s1953_s22, %s2388_s22   ;;  %s1860_s21 = sphi %s1951_s21, %s2387_s21  }
  0x11   : > { %2356 = sst [smem:[#allocation21_spill]] %s1872_s24  ;;  %s1370_s26 = sadd.s32 4294967294, %s1872_s24  }
  0x12   : > { %p53_p0 = scmp.ne.s32.totalorder %s1864_s22, %s1860_s21  ;;  %p2346_p1 = scmp.eq.s32.totalorder %s1972_s25, 0 }
  0x13   : > { %p323_p2 = scmp.eq.s32.totalorder %s1972_s25, 1  ;;  %p329_p3 = scmp.eq.s32.totalorder %s1370_s26, 1 }
  0x14   : > { %p1981_p4 = por %p2346_p1, %p53_p0  ;;  %p1371_p5 = scmp.ge.s32.totalorder %s1872_s24, 1 }
  0x15   : > { %p1986_p6 = por %p329_p3, %p53_p0  ;;  %p336_p7 = scmp.lt.s32.totalorder %s1872_s24, 3 }
  0x16   : > { %s2360_s4 = sld [smem:[#allocation27_spill]]  ;;  %s1874_s15 = smov [#allocation8]  }
  0x17   : > { %s2358_s28 = scalar_select %p1986_p6, 1, 0 }
  0x18   : > { %p1994_p8 = pnand %p1371_p5, %p336_p7  ;;  %s349_s16 = sshll.u32 %s1874_s15, 4  ;;  %s350_s16 = int_to_ptr.vmem [resolvable:$true] %s349_s16 }
  0x19   : > { %2359 = sst [smem:[#allocation22_spill]] %s2358_s28  ;;  %s2335_s26 = smov 128  }
  0x1a   : > { %p1452_p9 = pneg %p1994_p8  ;;  %s2363_s8 = sld [smem:[#allocation29_spill]] }
  0x1b   : > { %s2337_s29 = smov 8   ;;  %s1877_s30 = smov [#allocation11]  }
  0x1c   : > { %s347_s13 = sshll.u32 %s2360_s4, 4  ;;  %p2002_p10 = pnand %p1452_p9, %p2346_p1  ;;  %s348_s13 = int_to_ptr.hbm [resolvable:$true] %s347_s13 }
  0x1d   : > { %s383_s15 = sshll.u32 %s1877_s30, 4  ;;  %s2021_s18 = sadd.s32 1, %s1872_s24   ;;  %s384_s15 = int_to_ptr.vmem [resolvable:$true] %s383_s15 }
  0x1e   : > { %1455 = dma.hbm_to_vmem [thread:$0]  (!%p2002_p10), %s348_s13, 2048, %s350_s16, [#allocation9], %s2335_s26, %s2335_s26, %s2337_s29  }
  0x1f   : > { %2364 = sst [smem:[#allocation23_spill]] %s2021_s18  ;;  %s40_s19 = sadd.s32 1, %s1868_s23 }
  0x20   : > { %s381_s20 = sshll.u32 %s2363_s8, 4  ;;  %s37_s4 = ssub.s32 %s1872_s24, %s2021_s18  ;;  %s382_s20 = int_to_ptr.hbm [resolvable:$true] %s381_s20 }
  0x21   : > { %1461 = dma.hbm_to_vmem [thread:$0]  (!%p2002_p10), %s382_s20, 2048, %s384_s15, [#allocation12], %s2335_s26, %s2335_s26, %s2337_s29  }
  0x22   : > { %p47_p12 = scmp.ne.s32.totalorder %s1868_s23, %s1864_s22  ;;  %p38_p13 = scmp.eq.s32.totalorder %s37_s4, 0 }
  0x23   : > { %p48_p0 = scmp.eq.s32.totalorder %s1872_s24, 0  ;;  %p1483_p5 = scmp.lt.s32.totalorder %s1872_s24, 2 }
  0x24   : > { %p2031_p3 = por %p323_p2, %p47_p12  ;;  %s2342_s30 = sand.u32 1, %s1868_s23  }
  0x25   : > { %s2037_s16 = scalar_select %p38_p13, %s1868_s23, %s40_s19  }
  0x26   : > { %s2365_s13 = scalar_select %p2031_p3, 1, 0 }
  0x27   : > { %2367 = sst [smem:[#allocation25_spill]] %s2037_s16  ;;  %p49_p7 = por %p48_p0, %p47_p12 }
  0x28   : > { %2366 = sst [smem:[#allocation24_spill]] %s2365_s13  ;;  %s2042_s20 = sshll.u32 %s2342_s30, 4 }
  0x29   : > { %s2045_s15 = sshll.u32 %s1872_s24, 4  ;;  %p2047_p9 = pnand %p1483_p5, %p49_p7 }
  0x2a   : > { %s439_s26 = sand.u32 1, %s1872_s24   ;;  %s2369_s1 = sld [smem:[#allocation26_spill]] }
  0x2b   : > { %s443_s18 = scalar_lea.vmem [#allocation5], %s2042_s20  ;;  %s2057_s30 = scalar_lea.sflag [#allocation6], %s439_s26 }
  0x2c   : > { %s451_s28 = sshll.u32 %s443_s18, 4  ;;  %p1648_p12 = pneg %p2047_p9  ;;  %s452_s28 = int_to_ptr.vmem [resolvable:$true] %s451_s28 }
  0x30   : > { %s448_s19 = scalar_lea.hbm %s2369_s1, %s2045_s15  ;;  %s1651_s29 = scalar_lea.hbm %s2369_s1, 32 }
  0x31   : > { %s449_s16 = sshll.u32 %s448_s19, 4  ;;  %s450_s16 = int_to_ptr.hbm [resolvable:$true] %s449_s16 }
  0x32   : > { %s1644_s21 = sshra.s32 %s450_s16, 4  ;;  %s1645_s21 = int_to_ptr.hbm [resolvable:$true] %s1644_s21 }
  0x33   : > { %s1646_s12 = scalar_lea.hbm %s1645_s21, 16  ;;  %p1652_p5 = scmp.lt.s32.totalorder %s1645_s21, %s2369_s1 }
  0x34   : > { %p1647_p2 = scmp.ne.s32.totalorder %s1645_s21, %s1646_s12  ;;  %p1653_p7 = scmp.lt.s32.totalorder %s1651_s29, %s1646_s12 }
  0x36   : > { %p1649_p13 = pnand %p1648_p12, %p1647_p2  ;;  %p1654_p11 = por %p1653_p7, %p1652_p5 }
  0x38   : > { %p1650_p0 = pneg %p1649_p13 }
  0x3a   : > { %p1655_p1 = pnand %p1654_p11, %p1650_p0 }
  0x3c   : > { %1658 = shalt.err (!%p1655_p1)
}
  0x3d   : > { %s2370_s26 = smov 8   ;;  %s2371_s13 = smov 128  }
  0x3e   : > { %1471 = dma.hbm_to_vmem [thread:$0]  (!%p2047_p9), %s450_s16, 256, %s452_s28, %s2057_s30, %s2371_s13, %s2371_s13, %s2370_s26  }
  0x3f   : > { %s2372_s6 = sld [smem:[#allocation28_spill]]  ;;  %s1878_s12 = smov [#allocation10]  }
  0x40   : > { %s366_s21 = sshll.u32 %s1878_s12, 4  ;;  %s2373_s10 = sld [smem:[#allocation30_spill]]  ;;  %s367_s21 = int_to_ptr.vmem [resolvable:$true] %s366_s21 }
  0x41   : > { %s1879_s28 = smov [#allocation13]   ;;  %s426_s12 = scalar_lea.hbm %s2322_s0, %s2045_s15 }
  0x42   : > { %s400_s16 = sshll.u32 %s1879_s28, 4  ;;  %s421_s29 = scalar_lea.vmem [#allocation2], %s2042_s20  ;;  %s401_s16 = int_to_ptr.vmem [resolvable:$true] %s400_s16 }
  0x43   : > { %s429_s18 = sshll.u32 %s421_s29, 4  ;;  %s430_s18 = int_to_ptr.vmem [resolvable:$true] %s429_s18 }
  0x45   : > { %s364_s19 = sshll.u32 %s2372_s6, 4  ;;  %s427_s6 = sshll.u32 %s426_s12, 4  ;;  %s365_s19 = int_to_ptr.hbm [resolvable:$true] %s364_s19  ;;  %s428_s6 = int_to_ptr.hbm [resolvable:$true] %s427_s6 }
  0x46   : > { %s398_s1 = sshll.u32 %s2373_s10, 4  ;;  %s1734_s10 = sshra.s32 %s428_s6, 4  ;;  %s399_s1 = int_to_ptr.hbm [resolvable:$true] %s398_s1  ;;  %s1735_s10 = int_to_ptr.hbm [resolvable:$true] %s1734_s10 }
  0x47   : > { %1458 = dma.hbm_to_vmem [thread:$0]  (!%p2002_p10), %s365_s19, 2048, %s367_s21, [#allocation9], %s2371_s13, %s2371_s13, %s2370_s26  }
  0x48   : > { %1464 = dma.hbm_to_vmem [thread:$0]  (!%p2002_p10), %s399_s1, 2048, %s401_s16, [#allocation12], %s2371_s13, %s2371_s13, %s2370_s26  }
  0x49   : > { %s2374_s19 = sand.u32 1, %s1868_s23   ;;  %s1736_s28 = scalar_lea.hbm %s1735_s10, 16 }
  0x4a   : > { %s418_s21 = scalar_lea.sflag [#allocation3], %s2374_s19  ;;  %p1737_p1 = scmp.ne.s32.totalorder %s1735_s10, %s1736_s28 }
  0x4b   : > { %s1741_s16 = scalar_lea.hbm %s2322_s0, 32  ;;  %p1742_p10 = scmp.lt.s32.totalorder %s1735_s10, %s2322_s0 }
  0x4c   : > { %p1739_p11 = pnand %p1737_p1, %p1648_p12  ;;  %p1743_p13 = scmp.lt.s32.totalorder %s1741_s16, %s1736_s28 }
  0x4e   : > { %p1740_p2 = pneg %p1739_p11  ;;  %p1744_p0 = por %p1743_p13, %p1742_p10 }
  0x50   : > { %p1745_p5 = pnand %p1744_p0, %p1740_p2 }
  0x52   : > { %1748 = shalt.err (!%p1745_p5)
}
  0x53   : > { %1468 = dma.hbm_to_vmem [thread:$0]  (!%p2047_p9), %s428_s6, 256, %s430_s18, %s418_s21, %s2371_s13, %s2371_s13, %s2370_s26  }
  0x54   : > { %s470_s19 = scalar_lea.hbm %s2324_s2, %s2045_s15  ;;  %s465_s1 = scalar_lea.vmem [#allocation7], %s2042_s20 }
  0x55   : > { %s473_s17 = sshll.u32 %s465_s1, 4  ;;  %s471_s10 = sshll.u32 %s470_s19, 4  ;;  %s474_s17 = int_to_ptr.vmem [resolvable:$true] %s473_s17  ;;  %s472_s10 = int_to_ptr.hbm [resolvable:$true] %s471_s10 }
  0x56   : > { %s1764_s28 = sshra.s32 %s472_s10, 4  ;;  %s1771_s6 = scalar_lea.hbm %s2324_s2, 32  ;;  %s1765_s28 = int_to_ptr.hbm [resolvable:$true] %s1764_s28 }
  0x57   : > { %s1766_s16 = scalar_lea.hbm %s1765_s28, 16  ;;  %p1772_p2 = scmp.lt.s32.totalorder %s1765_s28, %s2324_s2 }
  0x58   : > { %p1767_p7 = scmp.ne.s32.totalorder %s1765_s28, %s1766_s16  ;;  %p1773_p10 = scmp.lt.s32.totalorder %s1771_s6, %s1766_s16 }
  0x5a   : > { %p1769_p1 = pnand %p1767_p7, %p1648_p12  ;;  %p1774_p13 = por %p1773_p10, %p1772_p2 }
  0x5c   : > { %p1770_p11 = pneg %p1769_p1 }
  0x5e   : > { %p1775_p0 = pnand %p1774_p13, %p1770_p11 }
  0x60   : > { %1778 = shalt.err (!%p1775_p0)
}
  0x61   : > { %1474 = dma.hbm_to_vmem [thread:$0]  (!%p2047_p9), %s472_s10, 256, %s474_s17, %s2057_s30, %s2371_s13, %s2371_s13, %s2370_s26  }
  0x62   : > { %491 = sbr.rel (%p1994_p8) target bundleno = 1504 (0x5e0), region = 68  ;;  %s2136_s20 = sand.u32 (!%p1994_p8), 1, %s1864_s22  }
  0x63   : > { %s2139_s15 = sshll.u32 (!%p1994_p8), %s2136_s20, 4  ;;  %s494_s12 = scalar_lea.sflag (!%p1994_p8), [#allocation3], %s2136_s20 }
  0x64   : > { %s497_s29 = scalar_lea.vmem (!%p1994_p8), [#allocation2], %s2139_s15 }
  0x67   : > { %1839 = dma.done.wait (%p1981_p4), %s494_s12, 256  }
  0x68   : > { %1841 = vsyncadd (%p1981_p4), %s494_s12, 4294967040  ;;  %s503_s14 = sand.u32 1, %s1972_s25   ;;  %s507_s30 = scalar_lea.vmem [#allocation5], %s2139_s15 }
  0x69   : > { %s504_s13 = scalar_lea.sflag [#allocation6], %s503_s14 }
  0x6a   : > { %1843 = dma.done.wait (%p1981_p4), %s504_s13, 512  }
  0x6b   : > { %1845 = vsyncadd (%p1981_p4), %s504_s13, 4294966784  ;;  %s517_s4 = scalar_lea.vmem [#allocation7], %s2139_s15  ;;  %p2375_p8 = scmp.eq.s32.totalorder %s1972_s25, 0 }
  0x6d   : > { %1847 = dma.done.wait (%p2375_p8), [#allocation9], 4096   ;;  %p2376_p9 = pmov %p2375_p8 }
  0x6e   : > { %p2377_p12 = pmov %p2375_p8 }
  0x6f   : > { %1849 = vsyncadd (%p2376_p9), [#allocation9], 4294963200 }
  0x70   : > { %1851 = dma.done.wait (%p2377_p12), [#allocation12], 4096   ;;  %p2378_p5 = pmov %p2375_p8 }
  0x71   : > { %v659_v0 = vld [vmem:[#allocation10 + $0x78] sm:$0xff]  ;;  %v658_v1 = vld [vmem:[#allocation10 + $0x70] sm:$0xff]  ;;  %v657_v3 = vld [vmem:[#allocation10 + $0x68] sm:$0xff]  ;;  %vm736_vm0 = vcmask 261120   ;;  %s1880_s19 = smov 64   ;;  %s1881_s1 = smov 96  }
  0x72   : > { %1853 = vsyncadd (%p2378_p5), [#allocation12], 4294963200  ;;  %664 = vmatpush.msra.mxu1 %v659_v0  ;;  %v702_v2 = vld [vmem:[#allocation11 + $0x78] sm:$0xff]  ;;  %v701_v4 = vld [vmem:[#allocation11 + $0x70] sm:$0xff]  ;;  %s1882_s24 = smov 32   ;;  %p592_p4 = scmp.lt.s32.totalorder %s1972_s25, 1 }
  0x73   : > { %707 = vmatpush.msra.mxu2 %v702_v2  ;;  %v700_v5 = vld [vmem:[#allocation11 + $0x68] sm:$0xff]  ;;  %v656_v6 = vld [vmem:[#allocation10 + $0x60] sm:$0xff]  ;;  %v655_v8 = vld [vmem:[#allocation10 + $0x58] sm:$0xff]  ;;  %vm772_vm2 = vcmask 130048   ;;  %vm1140_vm3 = vcmask 523264   ;;  %vm1143_vm4 = vcmask 785408  }
  0x74   : > { %665 = vmatpush.msra.mxu1 %v658_v1  ;;  %v699_v7 = vld [vmem:[#allocation11 + $0x60] sm:$0xff]  ;;  %v698_v9 = vld [vmem:[#allocation11 + $0x58] sm:$0xff]  ;;  %v654_v10 = vld [vmem:[#allocation10 + $0x50] sm:$0xff]  ;;  %s593_s8 = scalar_select %p592_p4, %s1972_s25, 1 }
  0x75   : > { %708 = vmatpush.msra.mxu2 %v701_v4  ;;  %v697_v11 = vld [vmem:[#allocation11 + $0x50] sm:$0xff]  ;;  %v653_v12 = vld [vmem:[#allocation10 + $0x48] sm:$0xff]  ;;  %v652_v14 = vld [vmem:[#allocation10 + $0x40] sm:$0xff]  ;;  %s591_s14 = scalar_lea.vmem [#allocation14], %s2139_s15  ;;  %s2380_s26 = sld [smem:[#allocation31_spill]] }
  0x76   : > { %666 = vmatpush.msra.mxu1 %v657_v3  ;;  %v696_v13 = vld [vmem:[#allocation11 + $0x48] sm:$0xff]  ;;  %v616_v15 = vld [vmem:[#allocation8 + $0x78] sm:$0xff]  ;;  %v615_v16 = vld [vmem:[#allocation8 + $0x70] sm:$0xff]  ;;  %s594_s21 = scalar_lea.vmem %s2325_s3, %s593_s8  ;;  %s1192_s10 = scalar_lea.sflag [#allocation4], %s2136_s20 }
  0x77   : > { %709 = vmatpush.msra.mxu2 %v700_v5  ;;  %v695_v17 = vld [vmem:[#allocation11 + $0x40] sm:$0xff]  ;;  %621 = vmatpush.msra.mxu0 %v616_v15  ;;  %v651_v18 = vld [vmem:[#allocation10 + $0x38] sm:$0xff]  ;;  %v614_v19 = vld [vmem:[#allocation8 + $0x68] sm:$0xff] }
  0x78   : > { %667 = vmatpush.msra.mxu1 %v656_v6  ;;  %v694_v20 = vld [vmem:[#allocation11 + $0x38] sm:$0xff]  ;;  %v650_v21 = vld [vmem:[#allocation10 + $0x30] sm:$0xff]  ;;  %v613_v22 = vld [vmem:[#allocation8 + $0x60] sm:$0xff] }
  0x79   : > { %710 = vmatpush.msra.mxu2 %v699_v7  ;;  %622 = vmatpush.msra.mxu0 %v615_v16  ;;  %v649_v23 = vld [vmem:[#allocation10 + $0x28] sm:$0xff]  ;;  %v693_v24 = vld [vmem:[#allocation11 + $0x30] sm:$0xff]  ;;  %v612_v25 = vld [vmem:[#allocation8 + $0x58] sm:$0xff] }
  0x7a   : > { %668 = vmatpush.msra.mxu1 %v655_v8  ;;  %v692_v26 = vld [vmem:[#allocation11 + $0x28] sm:$0xff]  ;;  %v648_v27 = vld [vmem:[#allocation10 + $0x20] sm:$0xff]  ;;  %v611_v28 = vld [vmem:[#allocation8 + $0x50] sm:$0xff] }
  0x7b   : > { %711 = vmatpush.msra.mxu2 %v698_v9  ;;  %623 = vmatpush.msra.mxu0 %v614_v19  ;;  %v691_v29 = vld [vmem:[#allocation11 + $0x20] sm:$0xff]  ;;  %v647_v30 = vld [vmem:[#allocation10 + $0x18] sm:$0xff]  ;;  %v610_v31 = vld [vmem:[#allocation8 + $0x48] sm:$0xff] }
  0x7c   : > { %669 = vmatpush.msra.mxu1 %v654_v10  ;;  %v690_v32 = vld [vmem:[#allocation11 + $0x18] sm:$0xff]  ;;  %v646_v33 = vld [vmem:[#allocation10 + $0x10] sm:$0xff]  ;;  %v609_v34 = vld [vmem:[#allocation8 + $0x40] sm:$0xff] }
  0x7d   : > { %712 = vmatpush.msra.mxu2 %v697_v11  ;;  %624 = vmatpush.msra.mxu0 %v613_v22  ;;  %v689_v35 = vld [vmem:[#allocation11 + $0x10] sm:$0xff]  ;;  %v645_v36 = vld [vmem:[#allocation10 + $0x8] sm:$0xff]  ;;  %v608_v37 = vld [vmem:[#allocation8 + $0x38] sm:$0xff] }
  0x7e   : > { %670 = vmatpush.msra.mxu1 %v653_v12  ;;  %v688_v38 = vld [vmem:[#allocation11 + $0x8] sm:$0xff]  ;;  %v644_v39 = vld [vmem:[#allocation10] sm:$0xff]  ;;  %v607_v40 = vld [vmem:[#allocation8 + $0x30] sm:$0xff]  ;;  %v1883_v12 = vmov 0.0  }
  0x7f   : > { %713 = vmatpush.msra.mxu2 %v696_v13  ;;  %625 = vmatpush.msra.mxu0 %v612_v25  ;;  %v597_v41 = vld [vmem:[%s507_s30] sm:$0xff]  ;;  %v606_v44 = vld [vmem:[#allocation8 + $0x28] sm:$0xff]  ;;  %v604_v46 = vld [vmem:[#allocation8 + $0x18] sm:$0xff] }
  0x80   : > { %671 = vmatpush.msra.mxu1 %v652_v14  ;;  %v687_v42 = vld [vmem:[#allocation11] sm:$0xff]  ;;  %v603_v47 = vld [vmem:[#allocation8 + $0x10] sm:$0xff]  ;;  %v598_v48 = vld [vmem:[%s507_s30 + $0x8] sm:$0xff]  ;;  %s1427_s30 = sshll.u32 %s1972_s25, 4 }
  0x81   : > { %714 = vmatpush.msra.mxu2 %v695_v17  ;;  %626 = vmatpush.msra.mxu0 %v611_v28  ;;  %v599_v43 = vld [vmem:[%s517_s4] sm:$0xff]  ;;  %v600_v49 = vld [vmem:[%s517_s4 + $0x8] sm:$0xff] }
  0x82   : > { %672 = vmatpush.msra.mxu1 %v651_v18  ;;  %v605_v45 = vld [vmem:[#allocation8 + $0x20] sm:$0xff]  ;;  %v602_v50 = vld [vmem:[#allocation8 + $0x8] sm:$0xff] }
  0x83   : > { %715 = vmatpush.msra.mxu2 %v694_v20  ;;  %627 = vmatpush.msra.mxu0 %v610_v31  ;;  %v601_v51 = vld [vmem:[#allocation8] sm:$0xff]  ;;  %v596_v53 = vld [vmem:[%s497_s29 + $0x8] sm:$0xff] }
  0x84   : > { %673 = vmatpush.msra.mxu1 %v650_v21  ;;  %v595_v52 = vld [vmem:[%s497_s29] sm:$0xff] }
  0x85   : > { %716 = vmatpush.msra.mxu2 %v693_v24  ;;  %628 = vmatpush.msra.mxu0 %v609_v34  ;;  %v1548_v55 = vld [vmem:[%s2329_s7] ss:$0 sm:$0xff] }
  0x86   : > { %674 = vmatpush.msra.mxu1 %v649_v23  ;;  %v1549_v59 = vld [vmem:[%s2331_s9] ss:$0 sm:$0xff] }
  0x87   : > { %717 = vmatpush.msra.mxu2 %v692_v26  ;;  %629 = vmatpush.msra.mxu0 %v608_v37  ;;  %v1550_v1 = vld [vmem:[%s2327_s5] ss:$0 sm:$0xff] }
  0x88   : > { %675 = vmatpush.msra.mxu1 %v648_v27  ;;  %v730_v11 = vld [vmem:[%s594_s21] sm:$0x1] }
  0x89   : > { %718 = vmatpush.msra.mxu2 %v691_v29  ;;  %630 = vmatpush.msra.mxu0 %v607_v40  ;;  %vm731_vm1 = vcmp.gt.f32.partialorder %v730_v11, 0.0 }
  0x8a   : > { %676 = vmatpush.msra.mxu1 %v647_v30  ;;  %v732_v13 = vsel %vm731_vm1, -1e+09, %v1883_v12 }
  0x8b   : > { %719 = vmatpush.msra.mxu2 %v690_v32  ;;  %631 = vmatpush.msra.mxu0 %v606_v44  ;;  %v2215_v14 = vperm.slane %v732_v13, 0 }
  0x8c   : > { %677 = vmatpush.msra.mxu1 %v646_v33 }
  0x8d   : > { %720 = vmatpush.msra.mxu2 %v689_v35  ;;  %632 = vmatpush.msra.mxu0 %v605_v45 }
  0x8e   : > { %678 = vmatpush.msra.mxu1 %v645_v36 }
  0x8f   : > { %721 = vmatpush.msra.mxu2 %v688_v38  ;;  %633 = vmatpush.msra.mxu0 %v604_v46 }
  0x90   : > { %679 = vmatpush.msra.mxu1 %v644_v39 }
  0x91   : > { %680 = vmatmul.f32.vlgmr.msra.gmra.mxu1 %v597_v41  ;;  %722 = vmatpush.msra.mxu2 %v687_v42 }
  0x92   : > { %723 = vmatmul.f32.vlgmr.msra.gmra.mxu2 %v599_v43  ;;  %634 = vmatpush.msra.mxu0 %v603_v47 }
  0x94   : > { %635 = vmatpush.msra.mxu0 %v602_v50 }
  0x96   : > { %636 = vmatpush.msra.mxu0 %v601_v51 }
  0x97   : > { %637 = vmatmul.f32.vlgmr.msra.gmra.mxu0 %v595_v52 }
  0x99   : > { %683 = vmatmul.f32.gmra.mxu1 %v598_v48 }
  0x9a   : > { %726 = vmatmul.f32.gmra.mxu2 %v600_v49 }
  0x9f   : > { %640 = vmatmul.f32.gmra.mxu0 %v596_v53 }
 0x10e   : > { %v681_v54 = vpop.f32.mrf.mxu1 }
 0x10f   : > { %v682_v60 = vadd.f32 %v1548_v55, %v681_v54 }
 0x114   : > { %v638_v0 = vpop.f32.mrf.mxu0 }
 0x115   : > { %v724_v58 = vpop.f32.mrf.mxu2  ;;  %v2195_v3 = vadd.f32 %v1550_v1, %v638_v0 }
 0x116   : > { %v684_v56 = vpop.f32.mrf.mxu1  ;;  %v2183_v61 = vadd.f32 %v1549_v59, %v724_v58 }
 0x117   : > { %v685_v57 = vadd.f32 %v1548_v55, %v684_v56 }
 0x119   : > { %928 = vrot.lane.b32.xlu1 %v685_v57, %s1880_s19  ;;  %830 = vrot.lane.b32.xlu2 %v685_v57, %s1881_s1 }
 0x11a   : > { %1395 = vmatpush.xpose.msk.msra.mxu3 %vm736_vm0, %v685_v57 }
 0x11c   : > { %v641_v2 = vpop.f32.mrf.mxu0 }
 0x11d   : > { %v727_v62 = vpop.f32.mrf.mxu2  ;;  %v2197_v4 = vadd.f32 %v1550_v1, %v641_v2 }
 0x11e   : > { %1396 = vmatpush.xpose.msk.msra.mxu3 %vm736_vm0, %v682_v60  ;;  %v728_v63 = vadd.f32 %v1549_v59, %v727_v62 }
 0x121   : > { %1397 = vmatmul.msk.f32.vlgmr.msra.gmra.mxu3 %vm736_vm0, %v2183_v61  ;;  %828 = vrot.lane.b32.xlu2 %v682_v60, %s1881_s1 }
 0x122   : > { %815 = vmatpush.msrb.mxu3 %v2197_v4 }
 0x124   : > { %816 = vmatpush.msrb.mxu3 %v2195_v3 }
 0x129   : > { %1398 = vmatmul.msk.f32.gmra.mxu3 %vm736_vm0, %v728_v63  ;;  %926 = vrot.lane.b32.xlu2 %v682_v60, %s1880_s19 }
 0x131   : > { %826 = vrot.lane.b32.xlu2 %v728_v63, %s1881_s1 }
 0x139   : > { %922 = vrot.lane.b32.xlu2 %v2183_v61, %s1880_s19 }
 0x141   : > { %1022 = vrot.lane.b32.xlu2 %v682_v60, %s1882_s24 }
 0x149   : > { %1020 = vrot.lane.b32.xlu2 %v728_v63, %s1882_s24 }
 0x173   : > { %v831_v5 = vpop.permute.xlu2 %830 }
 0x174   : > { %1401 = vmatpush.xpose.msk.msra.mxu3 %vm736_vm0, %v831_v5 }
 0x17b   : > { %v829_v6 = vpop.permute.xlu2 %828 }
 0x17c   : > { %1402 = vmatpush.xpose.msk.msra.mxu3 %vm736_vm0, %v829_v6  ;;  %v1533_v6 = vpack.i.bf16 %v2195_v3, %v2197_v4 }
 0x183   : > { %v927_v7 = vpop.permute.xlu2 %926 }
 0x18b   : > { %v929_v8 = vpop.permute.xlu1 %928  ;;  %v827_v9 = vpop.permute.xlu2 %826 }
 0x18c   : > { %1407 = vmatpush.xpose.msk.msrb.mxu2 %vm736_vm0, %v929_v8 }
 0x190   : > { %1408 = vmatpush.xpose.msk.msrb.mxu2 %vm736_vm0, %v927_v7 }
 0x193   : > { %v923_v10 = vpop.permute.xlu2 %922 }
 0x194   : > { %1409 = vmatmul.msk.f32.vlgmr.msrb.gmra.mxu2 %vm736_vm0, %v923_v10 }
 0x19b   : > { %v1023_v41 = vpop.permute.xlu2 %1022 }
 0x1a3   : > { %v1021_v47 = vpop.permute.xlu2 %1020 }
 0x1a4   : > { %v766_v15 = vpop.f32.mrf.mxu3 }
 0x1a5   : > { %v767_v16 = vadd.f32 %v766_v15, %v2215_v14 }
 0x1a7   : > { %v773_v17 = vsel %vm772_vm2, %v767_v16, -inf }
 0x1a8   : > { %774 = vmax.xlane.f32.xlu0 %v773_v17 }
 0x1ac   : > { %v769_v18 = vpop.f32.mrf.mxu3 }
 0x1ad   : > { %v770_v19 = vadd.f32 %v769_v18, %v2215_v14 }
 0x1af   : > { %v776_v20 = vsel %vm772_vm2, %v770_v19, -inf }
 0x1b0   : > { %777 = vmax.xlane.f32.xlu0 %v776_v20 }
 0x1c4   : > { %824 = vrot.lane.b32.xlu0 %v2183_v61, %s1881_s1 }
 0x1cc   : > { %1024 = vrot.lane.b32.xlu0 %v685_v57, %s1882_s24 }
 0x1d4   : > { %924 = vrot.lane.b32.xlu0 %v728_v63, %s1880_s19 }
 0x217   : > { %v955_v21 = vpop.f32.mrf.mxu2 }
 0x218   : > { %v956_v22 = vadd.f32 %v955_v21, %v2215_v14 }
 0x21a   : > { %v961_v23 = vsel %vm772_vm2, %v956_v22, -inf }
 0x21b   : > { %v775_v24 = vpop.xlane.xlu0 %774  ;;  %962 = vmax.xlane.f32.xlu2 %v961_v23 }
 0x21c   : > { %v779_v25 = vsub.f32 %v767_v16, %v775_v24 }
 0x21e   : > { %v781_v26 = vmul.f32 1.442695, %v779_v25 }
 0x220   : > { %1552 = vpow2.f32 %v781_v26 }
 0x223   : > { %v778_v27 = vpop.xlane.xlu0 %777 }
 0x224   : > { %v780_v28 = vsub.f32 %v770_v19, %v778_v27 }
 0x226   : > { %v1553_v29 = vpop.eup %1552  ;;  %v783_v30 = vmul.f32 1.442695, %v780_v28 }
 0x227   : > { %v785_v31 = vsel %vm772_vm2, %v1553_v29, 0.0 }
 0x228   : > { %1554 = vpow2.f32 %v783_v30  ;;  %786 = vadd.xlane.f32.xlu1 %v785_v31 }
 0x22e   : > { %v1555_v32 = vpop.eup %1554 }
 0x22f   : > { %v788_v33 = vsel %vm772_vm2, %v1555_v32, 0.0 }
 0x230   : > { %789 = vadd.xlane.f32.xlu1 %v788_v33 }
 0x236   : > { %v825_v34 = vpop.permute.xlu0 %824 }
 0x23e   : > { %v1025_v35 = vpop.permute.xlu0 %1024 }
 0x246   : > { %v925_v36 = vpop.permute.xlu0 %924 }
 0x247   : > { %1410 = vmatmul.msk.f32.gmra.mxu2 %vm736_vm0, %v925_v36 }
 0x249   : > { %1018 = vrot.lane.b32.xlu1 %v2183_v61, %s1882_s24 }
 0x28e   : > { %v963_v54 = vpop.xlane.xlu2 %962 }
 0x28f   : > { %v967_v57 = vsub.f32 %v956_v22, %v963_v54 }
 0x291   : > { %v969_v59 = vmul.f32 1.442695, %v967_v57 }
 0x29b   : > { %v787_v37 = vpop.xlane.xlu1 %786 }
 0x29c   : > { %1556 = vrcp.f32 %v787_v37 }
 0x2a2   : > { %v1557_v38 = vpop.eup %1556 }
 0x2a3   : > { %v790_v39 = vpop.xlane.xlu1 %789  ;;  %v793_v40 = vmul.f32 %v1557_v38, %v1553_v29 }
 0x2a4   : > { %1558 = vrcp.f32 %v790_v39 }
 0x2a5   : > { %1399 = vmatmul.msk.f32.vlgmr.msrb.gmra.mxu3 %vm772_vm2, %v793_v40  ;;  %1560 = vpow2.f32 %v969_v59 }
 0x2a6   : > { %1413 = vmatpush.xpose.msk.msrb.mxu3 %vm736_vm0, %v1025_v35 }
 0x2aa   : > { %v1559_v42 = vpop.eup %1558  ;;  %1414 = vmatpush.xpose.msk.msrb.mxu3 %vm736_vm0, %v1023_v41 }
 0x2ab   : > { %v794_v43 = vmul.f32 %v1559_v42, %v1555_v32  ;;  %v2252_v63 = vpop.eup %1560 }
 0x2ac   : > { %v973_v5 = vsel %vm772_vm2, %v2252_v63, 0.0 }
 0x2ad   : > { %1400 = vmatmul.msk.f32.gmra.mxu3 %vm772_vm2, %v794_v43 }
 0x2b5   : > { %1403 = vmatmul.msk.f32.vlgmr.msra.gmra.mxu3 %vm736_vm0, %v825_v34 }
 0x2bb   : > { %v1019_v44 = vpop.permute.xlu1 %1018 }
 0x2bd   : > { %1404 = vmatmul.msk.f32.gmra.mxu3 %vm736_vm0, %v827_v9 }
 0x2c5   : > { %1415 = vmatmul.msk.f32.vlgmr.msrb.gmra.mxu3 %vm736_vm0, %v1019_v44 }
 0x2ca   : > { %v958_v45 = vpop.f32.mrf.mxu2 }
 0x2cb   : > { %v959_v46 = vadd.f32 %v958_v45, %v2215_v14 }
 0x2cd   : > { %1416 = vmatmul.msk.f32.gmra.mxu3 %vm736_vm0, %v1021_v47  ;;  %v964_v48 = vsel %vm772_vm2, %v959_v46, -inf }
 0x2ce   : > { %965 = vmax.xlane.f32.xlu0 %v964_v48 }
 0x328   : > { %v2242_v49 = vpop.f32.mrf.mxu3 }
 0x330   : > { %v2244_v50 = vpop.f32.mrf.mxu3 }
 0x338   : > { %v857_v51 = vpop.f32.mrf.mxu3 }
 0x339   : > { %v858_v52 = vadd.f32 %v857_v51, %v2215_v14 }
 0x33b   : > { %v863_v53 = vsel %vm772_vm2, %v858_v52, -inf }
 0x33c   : > { %864 = vmax.xlane.f32.xlu1 %v863_v53 }
 0x340   : > { %v860_v55 = vpop.f32.mrf.mxu3 }
 0x341   : > { %v861_v56 = vadd.f32 %v860_v55, %v2215_v14  ;;  %v966_v7 = vpop.xlane.xlu0 %965 }
 0x342   : > { %v968_v8 = vsub.f32 %v959_v46, %v966_v7  ;;  %v1156_v7 = vld [vmem:[#allocation13 + $0x50] sm:$0xff] }
 0x343   : > { %v866_v58 = vsel %vm772_vm2, %v861_v56, -inf }
 0x344   : > { %867 = vmax.xlane.f32.xlu0 %v866_v58  ;;  %v971_v9 = vmul.f32 1.442695, %v968_v8 }
 0x346   : > { %1562 = vpow2.f32 %v971_v9  ;;  %v1155_v9 = vld [vmem:[#allocation13 + $0x48] sm:$0xff] }
 0x348   : > { %v1051_v60 = vpop.f32.mrf.mxu3 }
 0x349   : > { %v1052_v61 = vadd.f32 %v1051_v60, %v2215_v14 }
 0x34b   : > { %v1057_v62 = vsel %vm772_vm2, %v1052_v61, -inf }
 0x34c   : > { %1058 = vmax.xlane.f32.xlu1 %v1057_v62  ;;  %v1563_v10 = vpop.eup %1562 }
 0x34d   : > { %v976_v11 = vsel %vm772_vm2, %v1563_v10, 0.0 }
 0x350   : > { %v1054_v0 = vpop.f32.mrf.mxu3 }
 0x351   : > { %v1055_v1 = vadd.f32 %v1054_v0, %v2215_v14  ;;  %v1161_v0 = vld [vmem:[#allocation13 + $0x78] sm:$0xff] }
 0x352   : > { %1166 = vmatpush.msrb.mxu1 %v1161_v0 }
 0x353   : > { %v1060_v2 = vsel %vm772_vm2, %v1055_v1, -inf }
 0x354   : > { %1061 = vmax.xlane.f32.xlu2 %v1060_v2  ;;  %974 = vadd.xlane.f32.xlu1 %v973_v5  ;;  %v1159_v2 = vld [vmem:[#allocation13 + $0x68] sm:$0xff]  ;;  %v1158_v5 = vld [vmem:[#allocation13 + $0x60] sm:$0xff] }
 0x358   : > { %1534 = vrot.lane.b32.xlu0 %v1533_v6, %s1881_s1 }
 0x382   : > { %977 = vadd.xlane.f32.xlu0 %v976_v11  ;;  %v1153_v11 = vld [vmem:[#allocation13 + $0x38] sm:$0xff] }
 0x3af   : > { %v865_v12 = vpop.xlane.xlu1 %864 }
 0x3b0   : > { %v869_v13 = vsub.f32 %v858_v52, %v865_v12  ;;  %v1152_v12 = vld [vmem:[#allocation13 + $0x30] sm:$0xff] }
 0x3b2   : > { %v871_v14 = vmul.f32 1.442695, %v869_v13  ;;  %v1151_v13 = vld [vmem:[#allocation13 + $0x28] sm:$0xff] }
 0x3b4   : > { %1564 = vpow2.f32 %v871_v14  ;;  %v1150_v14 = vld [vmem:[#allocation13 + $0x20] sm:$0xff] }
 0x3b7   : > { %v868_v15 = vpop.xlane.xlu0 %867 }
 0x3b8   : > { %v870_v16 = vsub.f32 %v861_v56, %v868_v15  ;;  %v1149_v15 = vld [vmem:[#allocation13 + $0x18] sm:$0xff] }
 0x3ba   : > { %v1565_v17 = vpop.eup %1564  ;;  %v873_v18 = vmul.f32 1.442695, %v870_v16  ;;  %v1148_v16 = vld [vmem:[#allocation13 + $0x10] sm:$0xff] }
 0x3bb   : > { %v875_v3 = vsel %vm772_vm2, %v1565_v17, 0.0 }
 0x3bc   : > { %1566 = vpow2.f32 %v873_v18  ;;  %876 = vadd.xlane.f32.xlu1 %v875_v3  ;;  %v1146_v18 = vld [vmem:[#allocation13] sm:$0xff] }
 0x3bf   : > { %v1059_v4 = vpop.xlane.xlu1 %1058 }
 0x3c0   : > { %v1063_v19 = vsub.f32 %v1052_v61, %v1059_v4 }
 0x3c2   : > { %v1567_v20 = vpop.eup %1566  ;;  %v1065_v21 = vmul.f32 1.442695, %v1063_v19 }
 0x3c3   : > { %v878_v22 = vsel %vm772_vm2, %v1567_v20, 0.0 }
 0x3c4   : > { %1568 = vpow2.f32 %v1065_v21  ;;  %879 = vadd.xlane.f32.xlu2 %v878_v22 }
 0x3c7   : > { %v1062_v28 = vpop.xlane.xlu2 %1061  ;;  %v975_v33 = vpop.xlane.xlu1 %974 }
 0x3c8   : > { %v1064_v29 = vsub.f32 %v1055_v1, %v1062_v28  ;;  %v1160_v1 = vld [vmem:[#allocation13 + $0x70] sm:$0xff] }
 0x3c9   : > { %1167 = vmatpush.msrb.mxu1 %v1160_v1 }
 0x3ca   : > { %v1569_v23 = vpop.eup %1568  ;;  %v1535_v24 = vpop.permute.xlu0 %1534  ;;  %v1067_v30 = vmul.f32 1.442695, %v1064_v29 }
 0x3cb   : > { %v1069_v25 = vsel %vm772_vm2, %v1569_v23, 0.0  ;;  %v1536_v26 = vunpack.i.l.bf16 %v1535_v24  ;;  %v1537_v27 = vunpack.i.h.bf16 %v1535_v24  ;;  %1168 = vmatpush.msrb.mxu1 %v1159_v2 }
 0x3cc   : > { %1070 = vadd.xlane.f32.xlu1 %v1069_v25  ;;  %1570 = vpow2.f32 %v1067_v30 }
 0x3cd   : > { %913 = vmatpush.msrb.mxu0 %v1536_v26  ;;  %1169 = vmatpush.msrb.mxu1 %v1158_v5 }
 0x3cf   : > { %914 = vmatpush.msrb.mxu0 %v1537_v27 }
 0x3d2   : > { %v1571_v31 = vpop.eup %1570 }
 0x3d3   : > { %v1072_v32 = vsel %vm772_vm2, %v1571_v31, 0.0 }
 0x3dc   : > { %1539 = vrot.lane.b32.xlu2 %v1533_v6, %s1880_s19 }
 0x3e5   : > { %1544 = vrot.lane.b32.xlu1 %v1533_v6, %s1882_s24  ;;  %v1157_v6 = vld [vmem:[#allocation13 + $0x58] sm:$0xff] }
 0x3e6   : > { %1170 = vmatpush.msrb.mxu1 %v1157_v6 }
 0x3e8   : > { %1171 = vmatpush.msrb.mxu1 %v1156_v7 }
 0x3ea   : > { %1172 = vmatpush.msrb.mxu1 %v1155_v9 }
 0x3f5   : > { %v978_v39 = vpop.xlane.xlu0 %977 }
 0x405   : > { %1073 = vadd.xlane.f32.xlu2 %v1072_v32 }
 0x42f   : > { %v877_v34 = vpop.xlane.xlu1 %876 }
 0x430   : > { %1572 = vrcp.f32 %v877_v34 }
 0x436   : > { %v1573_v35 = vpop.eup %1572 }
 0x437   : > { %v880_v36 = vpop.xlane.xlu2 %879  ;;  %v883_v37 = vmul.f32 %v1573_v35, %v1565_v17  ;;  %v1147_v17 = vld [vmem:[#allocation13 + $0x8] sm:$0xff] }
 0x438   : > { %1574 = vrcp.f32 %v880_v36 }
 0x439   : > { %1405 = vmatmul.msk.f32.vlgmr.msrb.gmra.mxu0 %vm772_vm2, %v883_v37  ;;  %1576 = vrcp.f32 %v975_v33 }
 0x43a   : > { %1578 = vrcp.f32 %v978_v39 }
 0x43e   : > { %v1575_v38 = vpop.eup %1574 }
 0x43f   : > { %v1540_v40 = vpop.permute.xlu2 %1539  ;;  %v884_v41 = vmul.f32 %v1575_v38, %v1567_v20  ;;  %v1577_v42 = vpop.eup %1576 }
 0x440   : > { %v1541_v43 = vunpack.i.l.bf16 %v1540_v40  ;;  %v1542_v44 = vunpack.i.h.bf16 %v1540_v40  ;;  %v981_v45 = vmul.f32 %v1577_v42, %v2252_v63  ;;  %v1579_v46 = vpop.eup %1578  ;;  %v1071_v48 = vpop.xlane.xlu1 %1070 }
 0x441   : > { %1406 = vmatmul.msk.f32.gmra.mxu0 %vm772_vm2, %v884_v41  ;;  %v982_v47 = vmul.f32 %v1579_v46, %v1563_v10  ;;  %1580 = vrcp.f32 %v1071_v48  ;;  %v1154_v10 = vld [vmem:[#allocation13 + $0x40] sm:$0xff] }
 0x442   : > { %1009 = vmatpush.msra.mxu2 %v1541_v43  ;;  %1173 = vmatpush.msrb.mxu1 %v1154_v10 }
 0x444   : > { %1010 = vmatpush.msra.mxu2 %v1542_v44  ;;  %1174 = vmatpush.msrb.mxu1 %v1153_v11 }
 0x445   : > { %1411 = vmatmul.msk.f32.vlgmr.msra.gmra.mxu2 %vm772_vm2, %v981_v45 }
 0x446   : > { %1175 = vmatpush.msrb.mxu1 %v1152_v12 }
 0x447   : > { %v1581_v52 = vpop.eup %1580 }
 0x448   : > { %v1077_v55 = vmul.f32 %v1581_v52, %v1569_v23  ;;  %1176 = vmatpush.msrb.mxu1 %v1151_v13 }
 0x44a   : > { %1177 = vmatpush.msrb.mxu1 %v1150_v14 }
 0x44c   : > { %1178 = vmatpush.msrb.mxu1 %v1149_v15 }
 0x44d   : > { %1412 = vmatmul.msk.f32.gmra.mxu2 %vm772_vm2, %v982_v47 }
 0x44e   : > { %1179 = vmatpush.msrb.mxu1 %v1148_v16 }
 0x450   : > { %1180 = vmatpush.msrb.mxu1 %v1147_v17 }
 0x452   : > { %1181 = vmatpush.msrb.mxu1 %v1146_v18 }
 0x457   : > { %v1545_v51 = vpop.permute.xlu1 %1544 }
 0x458   : > { %v1546_v53 = vunpack.i.l.bf16 %v1545_v51  ;;  %v1547_v54 = vunpack.i.h.bf16 %v1545_v51 }
 0x45a   : > { %1105 = vmatpush.msra.mxu0 %v1546_v53 }
 0x45c   : > { %1106 = vmatpush.msra.mxu0 %v1547_v54 }
 0x45d   : > { %1417 = vmatmul.msk.f32.vlgmr.msra.gmra.mxu0 %vm772_vm2, %v1077_v55 }
 0x478   : > { %v1074_v56 = vpop.xlane.xlu2 %1073 }
 0x479   : > { %1582 = vrcp.f32 %v1074_v56 }
 0x47f   : > { %v1583_v57 = vpop.eup %1582 }
 0x480   : > { %v1078_v58 = vmul.f32 %v1583_v57, %v1571_v31 }
 0x482   : > { %1418 = vmatmul.msk.f32.gmra.mxu0 %vm772_vm2, %v1078_v58 }
 0x4b6   : > { %v916_v59 = vpop.f32.mrf.mxu0 }
 0x4be   : > { %v919_v61 = vpop.f32.mrf.mxu0 }
 0x4c8   : > { %v1012_v60 = vpop.f32.mrf.mxu2 }
 0x4c9   : > { %1124 = vrot.lane.b32.xlu1 %v1012_v60, %s1880_s19 }
 0x4d0   : > { %v1015_v63 = vpop.f32.mrf.mxu2 }
 0x4d1   : > { %1116 = vrot.lane.b32.xlu1 %v916_v59, %s1882_s24 }
 0x4d9   : > { %1118 = vrot.lane.b32.xlu1 %v919_v61, %s1882_s24  ;;  %s1814_s24 = scalar_lea.hbm %s2380_s26, 32 }
 0x4da   : > { %v1108_v62 = vpop.f32.mrf.mxu0 }
 0x4db   : > { %1132 = vrot.lane.b32.xlu0 %v1108_v62, %s1881_s1 }
 0x4e1   : > { %1126 = vrot.lane.b32.xlu1 %v1015_v63, %s1880_s19  ;;  %s1203_s19 = scalar_lea.hbm %s2380_s26, %s1427_s30 }
 0x4e2   : > { %s1206_s17 = sshll.u32 %s1203_s19, 4  ;;  %s1207_s17 = int_to_ptr.hbm [resolvable:$true] %s1206_s17 }
 0x4e3   : > { %s1808_s28 = sshra.s32 %s1207_s17, 4  ;;  %s1809_s28 = int_to_ptr.hbm [resolvable:$true] %s1808_s28 }
 0x4e4   : > { %s1810_s16 = scalar_lea.hbm %s1809_s28, 16  ;;  %p1815_p2 = scmp.lt.s32.totalorder %s1809_s28, %s2380_s26 }
 0x4e5   : > { %p1811_p7 = scmp.ne.s32.totalorder %s1809_s28, %s1810_s16  ;;  %p1816_p10 = scmp.lt.s32.totalorder %s1814_s24, %s1810_s16 }
 0x4e7   : > { %p1812_p1 = pnand %p1811_p7, %p2031_p3  ;;  %p1817_p13 = por %p1816_p10, %p1815_p2 }
 0x4e9   : > { %p1813_p11 = pneg %p1812_p1 }
 0x4eb   : > { %p1818_p0 = pnand %p1817_p13, %p1813_p11 }
 0x4ff   : > { %v1111_v8 = vpop.f32.mrf.mxu0 }
 0x500   : > { %1134 = vrot.lane.b32.xlu2 %v1111_v8, %s1881_s1  ;;  %s1204_s1 = sshll.u32 %s591_s14, 4  ;;  %s1205_s1 = int_to_ptr.vmem [resolvable:$true] %s1204_s1 }
 0x53b   : > { %v1125_v3 = vpop.permute.xlu1 %1124 }
 0x543   : > { %v1117_v4 = vpop.permute.xlu1 %1116 }
 0x544   : > { %v1138_v19 = vsel %vm736_vm0, %v2242_v49, %v1117_v4  ;;  %v1551_v49 = vld [vmem:[%s2333_s11] ss:$0 sm:$0xff] }
 0x545   : > { %v1141_v22 = vsel %vm1140_vm3, %v1138_v19, %v1125_v3 }
 0x54b   : > { %v1119_v20 = vpop.permute.xlu1 %1118 }
 0x54c   : > { %v1139_v25 = vsel %vm736_vm0, %v2244_v50, %v1119_v20 }
 0x54d   : > { %v1133_v21 = vpop.permute.xlu0 %1132 }
 0x54e   : > { %v1144_v23 = vsel %vm1143_vm4, %v1141_v22, %v1133_v21 }
 0x54f   : > { %1182 = vmatmul.f32.vlgmr.msrb.gmra.mxu1 %v1144_v23 }
 0x553   : > { %v1127_v24 = vpop.permute.xlu1 %1126 }
 0x554   : > { %v1142_v26 = vsel %vm1140_vm3, %v1139_v25, %v1127_v24 }
 0x55a   : > { %v1135_v27 = vpop.permute.xlu2 %1134 }
 0x55b   : > { %v1145_v28 = vsel %vm1143_vm4, %v1142_v26, %v1135_v27 }
 0x55c   : > { %1185 = vmatmul.f32.gmra.mxu1 %v1145_v28 }
 0x5cc   : > { %v1183_v29 = vpop.f32.mrf.mxu1 }
 0x5cd   : > { %v1184_v30 = vadd.f32 %v1551_v49, %v1183_v29 }
 0x5cf   : > { %1189 = vst [vmem:[%s591_s14] sm:$0xff] %v1184_v30 }
 0x5d9   : > { %v1186_v50 = vpop.f32.mrf.mxu1 }
 0x5da   : > { %v1187_v31 = vadd.f32 %v1551_v49, %v1186_v50 }
 0x5dc   : > { %1190 = vst [vmem:[%s591_s14 + $0x8] sm:$0xff] %v1187_v31 }
 0x5dd   : > { %1821 = shalt.err (!%p1818_p0)
}
 0x5de   : > { %s1884_s20 = smov 128   ;;  %s1885_s18 = smov 8  }
 0x5df   : > { %1450 = dma.vmem_to_hbm [thread:$0]  (%p2031_p3), %s1205_s1, 256, %s1207_s17, %s1192_s10, %s1884_s20, %s1884_s20, %s1885_s18  }
 0x5e0 PF: > { %s2381_s21 = sld [smem:[#allocation20_spill]] }
 0x5e1   : > { %s2383_s29 = sld [smem:[#allocation21_spill]] }
 0x5e6   : > { %s1221_s14 = sand.u32 1, %s2381_s21  }
 0x5e7   : > { %p2384_p8 = scmp.ge.s32.totalorder %s2383_s29, 2  ;;  %s1222_s30 = scalar_lea.sflag [#allocation4], %s1221_s14 }
 0x5e9   : > { %p1476_p9 = pnand %p2384_p8, %p1986_p6 }
 0x5eb   : > { %p1477_p12 = pneg %p1476_p9 }
 0x5ed   : > { %1855 = dma.done.wait (%p1477_p12), %s1222_s30, 256  }
 0x5ee   : > { %1857 = vsyncadd (%p1477_p12), %s1222_s30, 4294967040  ;;  %s2385_s24 = sld [smem:[#allocation23_spill]]  ;;  %s2387_s21 = smov %s1864_s22 }
 0x5ef   : > { %s2386_s4 = sld [smem:[#allocation25_spill]]  ;;  %s2388_s22 = smov %s1868_s23 }
 0x5f4   : > { %p30_p5 = scmp.ge.s32.totalorder %s2385_s24, 4  }
 0x5f5   : > { %s2389_s23 = smov %s2386_s4 }
 0x5f6   :  { %32 = sbr.rel (!%p30_p5) target bundleno = 16 (0x10), region = 156 }
 0x5fb   :  { %1228 = vsyncpa [#allocation3], 1 }
 0x5fc   :  { %1230 = vsyncpa [#allocation3 + $0x1], 1 }
 0x5fd   :  { %1231 = vsyncpa [#allocation6], 1 }
 0x5fe   :  { %1233 = vsyncpa [#allocation6 + $0x1], 1 }
 0x5ff   :  { %1234 = vsyncpa [#allocation9], 1 }
 0x600   :  { %1235 = vsyncpa [#allocation12], 1 }
 0x601   :  { %1236 = vsyncpa [#allocation4], 1 }
 0x602   :  { %1238 = vsyncpa [#allocation4 + $0x1], 1 }

</bundles_post_ra>
